<compile_context>
chip_gen: v7x
topology: tpu7x:2x2x1
jax: 0.10.0
libtpu: 0.0.40
codegen_flags: <defaults>
</compile_context>

<pallas_src>
import math
from functools import partial

import jax
import jax.numpy as jnp
from jax.experimental import pallas as pl
from jax.experimental.pallas import tpu as pltpu


def _round_up(x, m):
    return (x + m - 1) // m * m


def _mlp_kernel_acc(x_ref, w_ref, b_ref, o_ref, acc_ref):
    # x_ref: (tm, tk)   w_ref: (tk, tn)   b_ref: (1, tn) f32
    # o_ref: (tm, tn)   acc_ref: (tm, tn) f32 VMEM scratch
    k = pl.program_id(2)

    @pl.when(k == 0)
    def _():
        acc_ref[...] = jnp.zeros_like(acc_ref)

    acc_ref[...] += jnp.dot(x_ref[...], w_ref[...],
                            preferred_element_type=jnp.float32)

    @pl.when(k == pl.num_programs(2) - 1)
    def _():
        acc = acc_ref[...] + b_ref[...]                          # bias broadcast
        o_ref[...] = jnp.maximum(acc, 0.0).astype(o_ref.dtype)   # ReLU


def _mlp_kernel_single_k(x_ref, w_ref, b_ref, o_ref):
    # Entire contraction fits in one K tile: fuse dot + bias + ReLU, no scratch.
    acc = jnp.dot(x_ref[...], w_ref[...], preferred_element_type=jnp.float32)
    acc = acc + b_ref[...]
    o_ref[...] = jnp.maximum(acc, 0.0).astype(o_ref.dtype)


def mlp_layer(x, w, b=None, *, compute_dtype=None, tm=None, tn=None, tk=None):
    """ReLU(x @ w + b).  x: [M, K], w: [K, N], b: [N] or None -> [M, N]."""
    M, K = x.shape
    K2, N = w.shape
    assert K == K2, "x and w contraction dims must match"
    out_dtype = x.dtype
    cdt = jnp.dtype(x.dtype if compute_dtype is None else compute_dtype)

    # Tile selection: tm capped (multiple of 16 -> valid for f32 & bf16 tiles),
    # tn / tk multiples of 128 (lane-dense output, MXU-aligned contraction).
    if tm is None:
        tm = min(256, _round_up(M, 16))
    if tn is None:
        tn = min(512, _round_up(N, 128))
    if tk is None:
        tk = min(512, _round_up(K, 128))

    Mp, Kp, Np = _round_up(M, tm), _round_up(K, tk), _round_up(N, tn)

    xp = x.astype(cdt)
    wp = w.astype(cdt)
    if (Mp, Kp) != (M, K):
        xp = jnp.pad(xp, ((0, Mp - M), (0, Kp - K)))
    if (Kp, Np) != (K, N):
        wp = jnp.pad(wp, ((0, Kp - K), (0, Np - N)))
    bias = jnp.zeros((N,), jnp.float32) if b is None else b.astype(jnp.float32)
    bp = jnp.pad(bias, (0, Np - N)).reshape(1, Np)

    nm, nn, nk = Mp // tm, Np // tn, Kp // tk

    in_is = cdt.itemsize
    out_is = jnp.dtype(out_dtype).itemsize
    vmem_bytes = (2 * (tm * tk + tk * tn) * in_is   # double-buffered x/w tiles
                  + 2 * tn * 4                      # bias tile (f32)
                  + 2 * tm * tn * out_is            # double-buffered output
                  + tm * tn * 4)                    # f32 accumulator scratch
    vmem_limit = int(min(max(vmem_bytes + (8 << 20), 16 << 20), 48 << 20))

    cost = pl.CostEstimate(
        flops=2 * M * K * N,
        transcendentals=0,
        bytes_accessed=in_is * (M * K + K * N) + out_is * M * N + 4 * N,
    )

    if nk == 1:
        # Fused, scratch-free fast path (whole K in one tile).
        grid_spec = pltpu.PrefetchScalarGridSpec(
            num_scalar_prefetch=0,
            grid=(nm, nn),
            in_specs=[
                pl.BlockSpec((tm, Kp), lambda i, j: (i, 0)),
                pl.BlockSpec((Kp, tn), lambda i, j: (0, j)),
                pl.BlockSpec((1, tn), lambda i, j: (0, j)),
            ],
            out_specs=pl.BlockSpec((tm, tn), lambda i, j: (i, j)),
        )
        kernel = _mlp_kernel_single_k
        dim_sem = ("parallel", "parallel")
    else:
        grid_spec = pltpu.PrefetchScalarGridSpec(
            num_scalar_prefetch=0,
            grid=(nm, nn, nk),
            in_specs=[
                pl.BlockSpec((tm, tk), lambda i, j, k: (i, k)),
                pl.BlockSpec((tk, tn), lambda i, j, k: (k, j)),
                pl.BlockSpec((1, tn), lambda i, j, k: (0, j)),
            ],
            out_specs=pl.BlockSpec((tm, tn), lambda i, j, k: (i, j)),
            scratch_shapes=[pltpu.VMEM((tm, tn), jnp.float32)],
        )
        kernel = _mlp_kernel_acc
        dim_sem = ("parallel", "parallel", "arbitrary")

    out = pl.pallas_call(
        kernel,
        out_shape=jax.ShapeDtypeStruct((Mp, Np), out_dtype),
        grid_spec=grid_spec,
        compiler_params=pltpu.CompilerParams(
            dimension_semantics=dim_sem,
            vmem_limit_bytes=vmem_limit,
        ),
        cost_estimate=cost,
    )(xp, wp, bp)

    return out[:M, :N]


def init_mlp_params(key, dim_in, dim_out, dtype=jnp.float32):
    """Deterministic init matching nn.Linear defaults (uniform +-1/sqrt(dim_in))."""
    kw, kb = jax.random.split(key)
    bound = 1.0 / math.sqrt(dim_in)
    # PyTorch stores weight as [dim_out, dim_in]; we keep the transposed layout.
    w = jax.random.uniform(kw, (dim_in, dim_out), dtype, -bound, bound)
    b = jax.random.uniform(kb, (dim_out,), dtype, -bound, bound)
    return w, b


# TODO(synk): Sine-activation init branch of MLPLayer not implemented; default
# (activation=None -> ReLU) path is what this kernel covers.

if __name__ == "__main__":
    key = jax.random.PRNGKey(0)
    kx, kp, kx2, kp2 = jax.random.split(key, 4)

    # Small demo shapes matching the module (dim_in -> dim_out, ReLU);
    # exercises the fused single-K-step path.
    batch, dim_in, dim_out = 8, 32, 64
    x = jax.random.normal(kx, (batch, dim_in), jnp.float32)
    w, b = init_mlp_params(kp, dim_in, dim_out)

    out = jax.jit(mlp_layer)(x, w, b)
    jax.block_until_ready(out)
    ref = jnp.maximum(x @ w + b[None, :], 0.0)
    assert out.shape == (batch, dim_out)
    assert jnp.allclose(out, ref, atol=1e-5, rtol=1e-5)

    # Non-aligned shapes exercise M-padding, M-tiling and the 2-step
    # K-accumulation path (grid = (2, 1, 2)).
    M2, K2, N2 = 300, 1024, 384
    x2 = jax.random.normal(kx2, (M2, K2), jnp.float32)
    w2, b2 = init_mlp_params(kp2, K2, N2)
    out2 = jax.jit(mlp_layer)(x2, w2, b2)
    jax.block_until_ready(out2)
    ref2 = jnp.maximum(x2 @ w2 + b2[None, :], 0.0)
    assert out2.shape == (M2, N2)
    assert jnp.allclose(out2, ref2, atol=1e-4, rtol=1e-4)

    # bf16 MXU-input path (f32 accumulation in-kernel) — looser tolerance.
    out_bf16 = jax.jit(partial(mlp_layer, compute_dtype=jnp.bfloat16))(x2, w2, b2)
    jax.block_until_ready(out_bf16)
    assert jnp.allclose(out_bf16, ref2, atol=1e-1, rtol=5e-2)

    # No-bias path (use_bias=False in the module).
    out_nb = jax.jit(lambda a, ww: mlp_layer(a, ww, None))(x, w)
    jax.block_until_ready(out_nb)
    ref_nb = jnp.maximum(x @ w, 0.0)
    assert jnp.allclose(out_nb, ref_nb, atol=1e-5, rtol=1e-5)

    print("KERNEL_OK")
</pallas_src>

<mosaic_0001>
module attributes {stable_mosaic.version = 11 : i64} {
  func.func @_mlp_kernel_single_k(%arg0: i32, %arg1: i32, %arg2: memref<16x128xf32, #tpu.memory_space<vmem>>, %arg3: memref<128x128xf32, #tpu.memory_space<vmem>>, %arg4: memref<1x128xf32, #tpu.memory_space<vmem>>, %arg5: memref<16x128xf32, #tpu.memory_space<vmem>>) attributes {dimension_semantics = [#tpu.dimension_semantics<parallel>, #tpu.dimension_semantics<parallel>], iteration_bounds = array<i64: 1, 1>, scalar_prefetch = 0 : i64, scratch_operands = 0 : i64, tpu.core_type = #tpu.core_type<tc>, window_params = [{transform_indices = @transform_0, window_bounds = array<i64: 16, 128>}, {transform_indices = @transform_1, window_bounds = array<i64: 128, 128>}, {transform_indices = @transform_2, window_bounds = array<i64: 1, 128>}, {transform_indices = @transform_3, window_bounds = array<i64: 16, 128>}]} {
    %c0 = arith.constant 0 : index
    %c0_0 = arith.constant 0 : index
    %0 = vector.load %arg2[%c0, %c0_0] : memref<16x128xf32, #tpu.memory_space<vmem>>, vector<16x128xf32>
    %c0_1 = arith.constant 0 : index
    %c0_2 = arith.constant 0 : index
    %1 = vector.load %arg3[%c0_1, %c0_2] : memref<128x128xf32, #tpu.memory_space<vmem>>, vector<128x128xf32>
    %cst = arith.constant dense<0.000000e+00> : vector<16x128xf32>
    %2 = tpu.matmul %0, %1, %cst {dimension_numbers = #tpu.dot_dimension_numbers<[1], [0], [0], [1], [0, 0, 1, 1], [], []>} : vector<16x128xf32>, vector<128x128xf32>, vector<16x128xf32> -> vector<16x128xf32>
    %c0_3 = arith.constant 0 : index
    %c0_4 = arith.constant 0 : index
    %3 = vector.load %arg4[%c0_3, %c0_4] : memref<1x128xf32, #tpu.memory_space<vmem>>, vector<1x128xf32>
    %4 = vector.broadcast %3 : vector<1x128xf32> to vector<16x128xf32>
    %5 = arith.addf %2, %4 : vector<16x128xf32>
    %cst_5 = arith.constant 0.000000e+00 : f32
    %6 = vector.broadcast %cst_5 : f32 to vector<16x128xf32>
    %7 = arith.maximumf %5, %6 : vector<16x128xf32>
    %c0_6 = arith.constant 0 : index
    %c0_7 = arith.constant 0 : index
    %8 = vector.load %arg5[%c0_6, %c0_7] : memref<16x128xf32, #tpu.memory_space<vmem>>, vector<16x128xf32>
    tpu.vector_store %arg5[%c0_6, %c0_7], %7 {strides = array<i32>} : memref<16x128xf32, #tpu.memory_space<vmem>>, vector<16x128xf32>,
    return
  }
  func.func @transform_0(%arg0: i32, %arg1: i32) -> (i32, i32) {
    %c0_i32 = arith.constant 0 : i32
    %c0_i32_0 = arith.constant 0 : i32
    return %arg0, %c0_i32 : i32, i32
  }
  func.func @transform_1(%arg0: i32, %arg1: i32) -> (i32, i32) {
    %c0_i32 = arith.constant 0 : i32
    %c0_i32_0 = arith.constant 0 : i32
    return %c0_i32, %arg1 : i32, i32
  }
  func.func @transform_2(%arg0: i32, %arg1: i32) -> (i32, i32) {
    %c0_i32 = arith.constant 0 : i32
    %c0_i32_0 = arith.constant 0 : i32
    return %c0_i32, %arg1 : i32, i32
  }
  func.func @transform_3(%arg0: i32, %arg1: i32) -> (i32, i32) {
    %c0_i32 = arith.constant 0 : i32
    return %arg0, %arg1 : i32, i32
  }
}

</mosaic_0001>

<bundles_post_ra>
// kernel: mlp_layer.1
= control target key start
LH: loop header
LB: loop body
LE: loop exit
PB: predicated region body
PF: predicated region fallthrough
CT: control target
= control target key end

     0   :  { %s291_s1 = inlined_call_operand.vmem [shape: f32[128,128], index: 1, kind: input, shape index: {}]   ;;  %s292_s0 = inlined_call_operand.vmem [shape: f32[16,128], index: 0, kind: input, shape index: {}]   ;;  %s293_s2 = inlined_call_operand.vmem [shape: f32[1,128], index: 2, kind: input, shape index: {}]   ;;  %s294_s3 = inlined_call_operand.vmem [shape: f32[16,128], index: 3, kind: output, shape index: {}]  }
   0x1   :  { %v16_v0 = vld [vmem:[%s291_s1] sm:$0xff]  ;;  %v17_v1 = vld [vmem:[%s291_s1 + $0x8] sm:$0xff]  ;;  %v18_v2 = vld [vmem:[%s291_s1 + $0x10] sm:$0xff] }
   0x2   :  { %v176_v3 = vpack.c.bf16 %v17_v1, %v16_v0  ;;  %v19_v4 = vld [vmem:[%s291_s1 + $0x18] sm:$0xff]  ;;  %v20_v6 = vld [vmem:[%s291_s1 + $0x20] sm:$0xff]  ;;  %v21_v7 = vld [vmem:[%s291_s1 + $0x28] sm:$0xff] }
   0x3   :  { %v180_v5 = vpack.c.bf16 %v19_v4, %v18_v2  ;;  %v184_v8 = vpack.c.bf16 %v21_v7, %v20_v6  ;;  %v14_v9 = vld [vmem:[%s292_s0] sm:$0xff]  ;;  %v22_v10 = vld [vmem:[%s291_s1 + $0x30] sm:$0xff]  ;;  %v23_v11 = vld [vmem:[%s291_s1 + $0x38] sm:$0xff] }
   0x4   :  { %177 = vmatprep.subr.bf16.mxu0 %v176_v3  ;;  %173 = vmatprep.mubr.f32.mxu0 %v14_v9  ;;  %v188_v12 = vpack.c.bf16 %v23_v11, %v22_v10  ;;  %v24_v13 = vld [vmem:[%s291_s1 + $0x40] sm:$0xff]  ;;  %v25_v14 = vld [vmem:[%s291_s1 + $0x48] sm:$0xff]  ;;  %v26_v16 = vld [vmem:[%s291_s1 + $0x50] sm:$0xff] }
   0x5   :  { %179 = vmatpush3.bf16.msra.mxu0 %v176_v3  ;;  %v192_v15 = vpack.c.bf16 %v25_v14, %v24_v13  ;;  %v27_v17 = vld [vmem:[%s291_s1 + $0x58] sm:$0xff]  ;;  %v28_v19 = vld [vmem:[%s291_s1 + $0x60] sm:$0xff]  ;;  %v29_v20 = vld [vmem:[%s291_s1 + $0x68] sm:$0xff] }
   0x6   :  { %181 = vmatprep.subr.bf16.mxu0 %v180_v5  ;;  %v196_v18 = vpack.c.bf16 %v27_v17, %v26_v16  ;;  %v200_v21 = vpack.c.bf16 %v29_v20, %v28_v19  ;;  %v30_v22 = vld [vmem:[%s291_s1 + $0x70] sm:$0xff]  ;;  %v31_v23 = vld [vmem:[%s291_s1 + $0x78] sm:$0xff]  ;;  %v15_v25 = vld [vmem:[%s292_s0 + $0x8] sm:$0xff] }
   0x7   :  { %v204_v24 = vpack.c.bf16 %v31_v23, %v30_v22  ;;  %v122_v26 = vld [vmem:[%s293_s2] ss:$0 sm:$0xff] }
   0x9   :  { %183 = vmatpush3.bf16.msra.mxu0 %v180_v5 }
   0xa   :  { %185 = vmatprep.subr.bf16.mxu0 %v184_v8 }
   0xd   :  { %187 = vmatpush3.bf16.msra.mxu0 %v184_v8 }
   0xe   :  { %189 = vmatprep.subr.bf16.mxu0 %v188_v12 }
  0x11   :  { %191 = vmatpush3.bf16.msra.mxu0 %v188_v12 }
  0x12   :  { %193 = vmatprep.subr.bf16.mxu0 %v192_v15 }
  0x15   :  { %195 = vmatpush3.bf16.msra.mxu0 %v192_v15 }
  0x16   :  { %197 = vmatprep.subr.bf16.mxu0 %v196_v18 }
  0x19   :  { %199 = vmatpush3.bf16.msra.mxu0 %v196_v18 }
  0x1a   :  { %201 = vmatprep.subr.bf16.mxu0 %v200_v21 }
  0x1d   :  { %203 = vmatpush3.bf16.msra.mxu0 %v200_v21 }
  0x1e   :  { %205 = vmatprep.subr.bf16.mxu0 %v204_v24 }
  0x21   :  { %207 = vmatpush3.bf16.msra.mxu0 %v204_v24 }
  0x24   :  { %174 = vmatmul.mubr.f32.vlgmr.msra.gmra.mrb[0].mxu0 %v15_v25 }
  0xf7   :  { %v175_v27 = vpop.f32.mrb[0].mxu0 }
  0xf8   :  { %v111_v28 = vadd.f32 %v175_v27, %v122_v26  ;;  %v105_v29 = vpop.f32.mrb[1].mxu0 }
  0xf9   :  { %v106_v30 = vadd.f32 %v122_v26, %v105_v29 }
  0xfa   :  { %v115_v31 = vmax.f32 %v111_v28, 0.0 }
  0xfb   :  { %v114_v32 = vmax.f32 %v106_v30, 0.0 }
  0xfc   :  { %117 = vst [vmem:[%s294_s3 + $0x8] sm:$0xff] %v115_v31 }
  0xfd   :  { %116 = vst [vmem:[%s294_s3] sm:$0xff] %v114_v32 }

</bundles_post_ra>
